<compile_context>
chip_gen: v7x
topology: tpu7x:2x2x1
jax: 0.10.0
libtpu: 0.0.40
codegen_flags: <defaults>
</compile_context>

<pallas_src>
import functools

import jax
import jax.numpy as jnp
from jax.experimental import pallas as pl
from jax.experimental.pallas import tpu as pltpu


def _norm2d_kernel(x_ref, gamma_ref, beta_ref, o_ref, *, eps):
    # x_ref:     (bN, C, tile_cols)  channel-major slab of pixels
    # gamma_ref: (C, 1)              LayerNorm weight
    # beta_ref:  (C, 1)              LayerNorm bias
    x = x_ref[...].astype(jnp.float32)

    # Per-pixel LayerNorm over the channel (sublane) axis, one-pass moments.
    mean = jnp.mean(x, axis=1, keepdims=True)                  # (bN, 1, cols)
    mean_sq = jnp.mean(x * x, axis=1, keepdims=True)           # (bN, 1, cols)
    var = jnp.maximum(mean_sq - mean * mean, 0.0)
    inv_std = jax.lax.rsqrt(var + eps)

    gamma = gamma_ref[...].astype(jnp.float32)[None]           # (1, C, 1)
    beta = beta_ref[...].astype(jnp.float32)[None]             # (1, C, 1)
    o_ref[...] = ((x - mean) * (inv_std * gamma) + beta).astype(o_ref.dtype)


def _choose_blocking(N, C, HW, *, fp32_block_budget_bytes=5 * 1024 * 1024):
    """Pick (samples_per_block, pixel_tile_cols).

    The budget is stated in fp32 bytes for one (bN, C, tile_cols) block.
    Real VMEM footprint is ~<= 7x that (2x double-buffered input + 2x
    double-buffered output at input dtype, plus a few fp32 compute tiles),
    i.e. <= ~35 MiB with the 5 MiB budget — under the 48 MiB scoped limit.
    """
    cols_budget = fp32_block_budget_bytes // max(1, C * 4)

    if HW <= cols_budget:
        # Whole rows fit in one block: pack multiple samples per block.
        bN = max(1, min(N, cols_budget // max(1, HW)))
        tile_cols = HW
        if N >= 2:
            # Keep >= 2 grid blocks so both v7x TensorCores get work.
            bN = min(bN, (N + 1) // 2)
        elif HW > 128:
            # Single sample: split the pixel axis into >= 2 lane-dense tiles.
            tile_cols = min(HW, (((HW + 1) // 2 + 127) // 128) * 128)
        return bN, tile_cols

    # Large feature map: tile the pixel axis with lane-dense multiples of 128.
    # (For pathologically large C, cols_budget < 128 would overshoot the
    #  budget; not reachable for realistic embed dims with a 5 MiB budget.)
    tile_cols = max(128, (cols_budget // 128) * 128)
    return 1, tile_cols


def norm2d(x, gamma, beta, *, eps=1e-6):
    """LayerNorm over the channel dim of an NCHW tensor (PyTorch Norm2d)."""
    N, C, H, W = x.shape
    HW = H * W
    x3d = x.reshape(N, C, HW)                  # free view of NCHW (no data movement)

    bN, tile_cols = _choose_blocking(N, C, HW)

    gamma2d = gamma.reshape(C, 1)
    beta2d = beta.reshape(C, 1)

    grid = (pl.cdiv(N, bN), pl.cdiv(HW, tile_cols))

    out3d = pl.pallas_call(
        functools.partial(_norm2d_kernel, eps=eps),
        out_shape=jax.ShapeDtypeStruct((N, C, HW), x.dtype),
        grid_spec=pltpu.PrefetchScalarGridSpec(
            num_scalar_prefetch=0,
            grid=grid,
            in_specs=[
                pl.BlockSpec((bN, C, tile_cols), lambda n, j: (n, 0, j)),
                pl.BlockSpec((C, 1), lambda n, j: (0, 0)),
                pl.BlockSpec((C, 1), lambda n, j: (0, 0)),
            ],
            out_specs=pl.BlockSpec((bN, C, tile_cols), lambda n, j: (n, 0, j)),
        ),
        compiler_params=pltpu.CompilerParams(
            dimension_semantics=("parallel", "parallel"),
            vmem_limit_bytes=48 * 1024 * 1024,
        ),
    )(x3d, gamma2d, beta2d)

    return out3d.reshape(N, C, H, W)


def _reference(x, gamma, beta, eps=1e-6):
    # Pure-JAX reference (matches the PyTorch permute -> LayerNorm -> permute),
    # using the two-pass variance to cross-check the one-pass kernel formula.
    x_nhwc = jnp.transpose(x, (0, 2, 3, 1)).astype(jnp.float32)
    mean = jnp.mean(x_nhwc, axis=-1, keepdims=True)
    var = jnp.mean((x_nhwc - mean) ** 2, axis=-1, keepdims=True)
    ref_nhwc = (x_nhwc - mean) * jax.lax.rsqrt(var + eps) * gamma + beta
    return jnp.transpose(ref_nhwc, (0, 3, 1, 2)).astype(x.dtype)


if __name__ == "__main__":
    key = jax.random.PRNGKey(0)
    k_x, k_g, k_b, k_x2 = jax.random.split(key, 4)

    # Case 1: embed_dim = 32, 16x16 feature map.
    N, C, H, W = 2, 32, 16, 16
    x = jax.random.normal(k_x, (N, C, H, W), dtype=jnp.float32)
    # Deterministic, non-trivial LayerNorm params (default init is ones/zeros).
    gamma = 1.0 + 0.1 * jax.random.normal(k_g, (C,), dtype=jnp.float32)
    beta = 0.1 * jax.random.normal(k_b, (C,), dtype=jnp.float32)

    out = jax.block_until_ready(norm2d(x, gamma, beta))
    ref = _reference(x, gamma, beta)
    assert out.shape == x.shape
    assert jnp.allclose(out, ref, atol=1e-5, rtol=1e-5)

    # Case 2: small 7x7 feature map, N=4 — exercises the sample-batched
    # (bN > 1) path with a non-128-multiple lane width.
    N2, H2, W2 = 4, 7, 7
    x2 = jax.random.normal(k_x2, (N2, C, H2, W2), dtype=jnp.float32)
    out2 = jax.block_until_ready(norm2d(x2, gamma, beta))
    ref2 = _reference(x2, gamma, beta)
    assert out2.shape == x2.shape
    assert jnp.allclose(out2, ref2, atol=1e-5, rtol=1e-5)

    print("KERNEL_OK")
</pallas_src>

<mosaic_0001>
module attributes {stable_mosaic.version = 11 : i64} {
  func.func @_norm2d_kernel(%arg0: i32, %arg1: i32, %arg2: memref<1x32x256xf32, #tpu.memory_space<vmem>>, %arg3: memref<32x1xf32, #tpu.memory_space<vmem>>, %arg4: memref<32x1xf32, #tpu.memory_space<vmem>>, %arg5: memref<1x32x256xf32, #tpu.memory_space<vmem>>) attributes {dimension_semantics = [#tpu.dimension_semantics<parallel>, #tpu.dimension_semantics<parallel>], iteration_bounds = array<i64: 2, 1>, scalar_prefetch = 0 : i64, scratch_operands = 0 : i64, tpu.core_type = #tpu.core_type<tc>, window_params = [{transform_indices = @transform_0, window_bounds = array<i64: 1, 32, 256>}, {pipeline_mode = #tpu.pipeline_mode<synchronous>, transform_indices = @transform_1, window_bounds = array<i64: 32, 1>}, {pipeline_mode = #tpu.pipeline_mode<synchronous>, transform_indices = @transform_2, window_bounds = array<i64: 32, 1>}, {transform_indices = @transform_3, window_bounds = array<i64: 1, 32, 256>}]} {
    %c0 = arith.constant 0 : index
    %c0_0 = arith.constant 0 : index
    %c0_1 = arith.constant 0 : index
    %0 = vector.load %arg2[%c0, %c0_0, %c0_1] : memref<1x32x256xf32, #tpu.memory_space<vmem>>, vector<1x32x256xf32>
    %cst = arith.constant dense<0.000000e+00> : vector<1x256xf32>
    %1 = vector.multi_reduction <add>, %0, %cst [1] : vector<1x32x256xf32> to vector<1x256xf32>
    %2 = vector.shape_cast %1 : vector<1x256xf32> to vector<1x1x256xf32>
    %cst_2 = arith.constant 3.200000e+01 : f32
    %3 = vector.broadcast %cst_2 : f32 to vector<1x1x256xf32>
    %4 = arith.divf %2, %3 : vector<1x1x256xf32>
    %5 = arith.mulf %0, %0 : vector<1x32x256xf32>
    %cst_3 = arith.constant dense<0.000000e+00> : vector<1x256xf32>
    %6 = vector.multi_reduction <add>, %5, %cst_3 [1] : vector<1x32x256xf32> to vector<1x256xf32>
    %7 = vector.shape_cast %6 : vector<1x256xf32> to vector<1x1x256xf32>
    %cst_4 = arith.constant 3.200000e+01 : f32
    %8 = vector.broadcast %cst_4 : f32 to vector<1x1x256xf32>
    %9 = arith.divf %7, %8 : vector<1x1x256xf32>
    %10 = arith.mulf %4, %4 : vector<1x1x256xf32>
    %11 = arith.subf %9, %10 : vector<1x1x256xf32>
    %cst_5 = arith.constant 0.000000e+00 : f32
    %12 = vector.broadcast %cst_5 : f32 to vector<1x1x256xf32>
    %13 = arith.maximumf %11, %12 : vector<1x1x256xf32>
    %cst_6 = arith.constant 9.99999997E-7 : f32
    %14 = vector.broadcast %cst_6 : f32 to vector<1x1x256xf32>
    %15 = arith.addf %13, %14 : vector<1x1x256xf32>
    %16 = math.rsqrt %15 : vector<1x1x256xf32>
    %c0_7 = arith.constant 0 : index
    %c0_8 = arith.constant 0 : index
    %17 = vector.load %arg3[%c0_7, %c0_8] : memref<32x1xf32, #tpu.memory_space<vmem>>, vector<32x1xf32>
    %18 = vector.shape_cast %17 : vector<32x1xf32> to vector<1x32x1xf32>
    %c0_9 = arith.constant 0 : index
    %c0_10 = arith.constant 0 : index
    %19 = vector.load %arg4[%c0_9, %c0_10] : memref<32x1xf32, #tpu.memory_space<vmem>>, vector<32x1xf32>
    %20 = vector.shape_cast %19 : vector<32x1xf32> to vector<1x32x1xf32>
    %21 = vector.broadcast %4 : vector<1x1x256xf32> to vector<1x32x256xf32>
    %22 = arith.subf %0, %21 : vector<1x32x256xf32>
    %23 = vector.broadcast %16 : vector<1x1x256xf32> to vector<1x32x256xf32>
    %24 = vector.broadcast %18 : vector<1x32x1xf32> to vector<1x32x256xf32>
    %25 = arith.mulf %23, %24 : vector<1x32x256xf32>
    %26 = arith.mulf %22, %25 : vector<1x32x256xf32>
    %27 = vector.broadcast %20 : vector<1x32x1xf32> to vector<1x32x256xf32>
    %28 = arith.addf %26, %27 : vector<1x32x256xf32>
    %c0_11 = arith.constant 0 : index
    %c0_12 = arith.constant 0 : index
    %c0_13 = arith.constant 0 : index
    %29 = vector.load %arg5[%c0_11, %c0_12, %c0_13] : memref<1x32x256xf32, #tpu.memory_space<vmem>>, vector<1x32x256xf32>
    tpu.vector_store %arg5[%c0_11, %c0_12, %c0_13], %28 {strides = array<i32>} : memref<1x32x256xf32, #tpu.memory_space<vmem>>, vector<1x32x256xf32>,
    return
  }
  func.func @transform_0(%arg0: i32, %arg1: i32) -> (i32, i32, i32) {
    %c0_i32 = arith.constant 0 : i32
    %c0_i32_0 = arith.constant 0 : i32
    return %arg0, %c0_i32, %arg1 : i32, i32, i32
  }
  func.func @transform_1(%arg0: i32, %arg1: i32) -> (i32, i32) {
    %c0_i32 = arith.constant 0 : i32
    %c0_i32_0 = arith.constant 0 : i32
    %c0_i32_1 = arith.constant 0 : i32
    return %c0_i32, %c0_i32_0 : i32, i32
  }
  func.func @transform_2(%arg0: i32, %arg1: i32) -> (i32, i32) {
    %c0_i32 = arith.constant 0 : i32
    %c0_i32_0 = arith.constant 0 : i32
    %c0_i32_1 = arith.constant 0 : i32
    return %c0_i32, %c0_i32_0 : i32, i32
  }
  func.func @transform_3(%arg0: i32, %arg1: i32) -> (i32, i32, i32) {
    %c0_i32 = arith.constant 0 : i32
    %c0_i32_0 = arith.constant 0 : i32
    return %arg0, %c0_i32, %arg1 : i32, i32, i32
  }
}

</mosaic_0001>

<bundles_post_ra>
// kernel: tpu_custom_call.1
= control target key start
LH: loop header
LB: loop body
LE: loop exit
PB: predicated region body
PF: predicated region fallthrough
CT: control target
= control target key end

     0   :  { %8 = vsyncpa [#allocation3], 0  ;;  %s959_s0 = inlined_call_operand.hbm [shape: f32[2,32,256], index: 0, kind: input, shape index: {}]   ;;  %s960_s1 = inlined_call_operand.vmem [shape: f32[32,1], index: 1, kind: input, shape index: {}]   ;;  %s961_s2 = inlined_call_operand.vmem [shape: f32[32,1], index: 2, kind: input, shape index: {}]   ;;  %s962_s3 = inlined_call_operand.hbm [shape: f32[2,32,256], index: 3, kind: output, shape index: {}]  }
   0x1   :  { %10 = vsyncpa [#allocation3 + $0x1], 0 }
   0x2   :  { %11 = vsyncpa [#allocation4], 0 }
   0x3   :  { %13 = vsyncpa [#allocation4 + $0x1], 0  ;;  %s698_s12 = smov 0   ;;  %s700_s13 = smov 0  }
   0x4   :  { %s702_s14 = smov 0   ;;  %s704_s15 = smov 0  }
   0x5   :  { %s706_s16 = smov 0   ;;  %s708_s17 = smov 0  }
   0x6 LB: > { %s467_s18 = sadd.s32 4294967295, %s669_s17   ;;  %s468_s19 = sadd.s32 4294967294, %s669_s17   ;;  %s669_s17 = sphi %s708_s17, %s19_s17   ;;  %s665_s16 = sphi %s706_s16, %s977_s16   ;;  %s661_s15 = sphi %s704_s15, %s976_s15   ;;  %s657_s14 = sphi %s702_s14, %s975_s14   ;;  %s653_s13 = sphi %s700_s13, %s974_s13   ;;  %s649_s12 = sphi %s698_s12, %s973_s12  }
   0x7   : > { %s31_s20 = sadd.s32 1, %s665_s16  ;;  %s40_s21 = sadd.s32 1, %s657_s14 }
   0x8   : > { %p33_p0 = scmp.ge.s32.totalorder %s31_s20, 2  ;;  %p47_p1 = scmp.ne.s32.totalorder %s657_s14, %s653_s13 }
   0x9   : > { %p48_p2 = scmp.eq.s32.totalorder %s669_s17, 0  ;;  %p53_p3 = scmp.ne.s32.totalorder %s653_s13, %s649_s12 }
   0xa   : > { %s979_s20 = smov (%p33_p0, %s31_s20), 0  ;;  %p54_p5 = scmp.eq.s32.totalorder %s467_s18, 0 }
   0xb   : > { %p739_p4 = por %p48_p2, %p47_p1  ;;  %s35_s23 = ssub.s32 %s665_s16, %s979_s20 }
   0xc   : > { %p121_p6 = scmp.eq.s32.totalorder %s467_s18, 1  ;;  %p38_p7 = scmp.eq.s32.totalorder %s35_s23, 0 }
   0xd   : > { %p745_p8 = por %p54_p5, %p53_p3  ;;  %p127_p10 = scmp.eq.s32.totalorder %s468_s19, 1 }
   0xe   : > { %p749_p9 = por %p121_p6, %p47_p1  ;;  %p496_p13 = scmp.lt.s32.totalorder %s669_s17, 2 }
   0xf   : > { %s754_s26 = scalar_select %p38_p7, %s657_s14, %s40_s21  }
  0x10   : > { %s966_s25 = scalar_select %p749_p9, 1, 0 }
  0x11   : > { %p756_p11 = por %p127_p10, %p53_p3  ;;  %s153_s28 = sand.u32 1, %s657_s14  }
  0x12   : > { %s471_s29 = sshll.u32 %s153_s28, 6  ;;  %s482_s30 = sshll.u32 %s665_s16, 10 }
  0x13   : > { %s967_s27 = scalar_select %p756_p11, 1, 0 }
  0x14   : > { %s767_s6 = scalar_lea.hbm %s959_s0, %s482_s30  ;;  %s157_s7 = scalar_lea.vmem [#allocation2], %s471_s29 }
  0x15   : > { %s166_s8 = sshll.u32 %s157_s7, 4  ;;  %p773_p0 = pnand %p496_p13, %p739_p4  ;;  %s769_s8 = int_to_ptr.vmem [resolvable:$true] %s166_s8 }
  0x16   : > { %s778_s10 = scalar_lea.sflag [#allocation3], %s153_s28  ;;  %s557_s11 = scalar_lea.hbm %s767_s6, 1024 }
  0x17   : > { %p558_p2 = scmp.ne.s32.totalorder %s767_s6, %s557_s11  ;;  %p559_p3 = pneg %p773_p0 }
  0x18   : > { %s562_s21 = scalar_lea.hbm %s959_s0, 2048  ;;  %p563_p4 = scmp.lt.u32.totalorder %s767_s6, %s959_s0 }
  0x19   : > { %p560_p5 = pnand %p559_p3, %p558_p2  ;;  %p564_p7 = scmp.lt.u32.totalorder %s562_s21, %s557_s11 }
  0x1a   : > { %p566_p13 = scmp.lt.u32.totalorder %s557_s11, %s767_s6 }
  0x1b   : > { %p561_p6 = pneg %p560_p5  ;;  %p565_p10 = por %p564_p7, %p563_p4 }
  0x1d   : > { %p567_p12 = por %p566_p13, %p565_p10 }
  0x1f   : > { %p568_p1 = pnand %p567_p12, %p561_p6 }
  0x21   : > { %571 = shalt.err (!%p568_p1)
}
  0x22   : > { %s572_s28 = scalar_lea.vmem %s769_s8, 1024  ;;  %s671_s29 = smov [#allocation2]  }
  0x23   : > { %p573_p2 = scmp.ne.s32.totalorder %s769_s8, %s572_s28  ;;  %s577_s30 = sshll.u32 %s671_s29, 4  ;;  %s578_s30 = int_to_ptr.vmem [resolvable:$false] %s577_s30 }
  0x24   : > { %s579_s4 = scalar_lea.vmem %s578_s30, 2048  ;;  %p580_p9 = scmp.lt.s32.totalorder %s769_s8, %s578_s30 }
  0x25   : > { %p575_p5 = pnand %p573_p2, %p559_p3  ;;  %p581_p4 = scmp.lt.s32.totalorder %s579_s4, %s572_s28 }
  0x27   : > { %p576_p11 = pneg %p575_p5  ;;  %p582_p7 = por %p581_p4, %p580_p9 }
  0x29   : > { %p583_p10 = pnand %p582_p7, %p576_p11 }
  0x2b   : > { %586 = shalt.err (!%p583_p10)
}
  0x2c   : > { %s672_s5 = smov 256   ;;  %s673_s7 = smov 16  }
  0x2d   : > { %491 = dma.hbm_to_vmem [thread:$0]  (!%p773_p0), %s767_s6, 1024, %s769_s8, %s778_s10, %s672_s5, %s672_s5, %s673_s7  }
  0x2e   : > { %p174_p12 = scmp.lt.s32.totalorder %s669_s17, 3  ;;  %p969_p1 = scmp.ge.s32.totalorder %s669_s17, 1 }
  0x30   : > { %p175_p3 = pnand %p969_p1, %p174_p12 }
  0x31   : > { %s810_s11 = sand.u32 (!%p175_p3), 1, %s653_s13  }
  0x32   : > { %178 = sbr.rel (%p175_p3) target bundleno = 218 (0xda), region = 32  ;;  %s475_s18 = sshll.u32 (!%p175_p3), %s810_s11, 6 }
  0x33   : > { %s181_s19 = scalar_lea.sflag (!%p175_p3), [#allocation3], %s810_s11  ;;  %s816_s21 = scalar_lea.vmem (!%p175_p3), [#allocation2], %s475_s18 }
  0x39   : > { %640 = dma.done.wait (%p745_p8), %s181_s19, 1024  }
  0x3a   : > { %642 = vsyncadd (%p745_p8), %s181_s19, 4294966272  ;;  %v674_v0 = vmov 0   ;;  %v278_v1 = vld [vmem:[%s960_s1 + $0x10] sm:$0xff]  ;;  %v276_v2 = vld [vmem:[%s960_s1] sm:$0xff]  ;;  %s483_s10 = sshll.u32 %s661_s15, 10  ;;  %s365_s23 = scalar_lea.sflag [#allocation4], %s810_s11 }
  0x3b   : > { %552 = vset.pattern.permute.xlu1 %v674_v0  ;;  %551 = vset.pattern.permute.xlu0 %v674_v0  ;;  %v279_v3 = vld [vmem:[%s960_s1 + $0x18] sm:$0xff]  ;;  %v277_v4 = vld [vmem:[%s960_s1 + $0x8] sm:$0xff]  ;;  %v280_v6 = vld [vmem:[%s961_s2] sm:$0xff]  ;;  %s910_s15 = scalar_lea.hbm %s962_s3, %s483_s10  ;;  %p970_p9 = scmp.ne.s32.totalorder %s966_s25, 0 }
  0x3c   : > { %304 = vperm.xlu1 %552, %v278_v1   ;;  %294 = vperm.xlu0 %551, %v276_v2   ;;  %v281_v5 = vld [vmem:[%s961_s2 + $0x8] sm:$0xff]  ;;  %v283_v7 = vld [vmem:[%s961_s2 + $0x18] sm:$0xff]  ;;  %v282_v8 = vld [vmem:[%s961_s2 + $0x10] sm:$0xff]  ;;  %s675_s28 = smov [#allocation5]  }
  0x3d   : > { %v847_v9 = vld [vmem:[%s816_s21] sm:$0xff]  ;;  %v850_v10 = vld [vmem:[%s816_s21 + $0x10] sm:$0xff]  ;;  %v853_v11 = vld [vmem:[%s816_s21 + $0x8] sm:$0xff]  ;;  %s591_s29 = sshll.u32 %s675_s28, 4  ;;  %s592_s29 = int_to_ptr.vmem [resolvable:$false] %s591_s29 }
  0x3e   : > { %v856_v12 = vld [vmem:[%s816_s21 + $0x18] sm:$0xff]  ;;  %v217_v13 = vadd.f32 %v850_v10, %v847_v9  ;;  %v238_v14 = vmul.f32 %v847_v9, %v847_v9  ;;  %v240_v15 = vmul.f32 %v850_v10, %v850_v10  ;;  %v865_v16 = vld [vmem:[%s816_s21 + $0x20] sm:$0xff]  ;;  %v239_v18 = vmul.f32 %v853_v11, %v853_v11  ;;  %v874_v20 = vld [vmem:[%s816_s21 + $0x28] sm:$0xff]  ;;  %s593_s30 = scalar_lea.vmem %s592_s29, 2048 }
  0x3f   : > { %v226_v17 = vadd.f32 %v856_v12, %v853_v11  ;;  %v241_v19 = vmul.f32 %v856_v12, %v856_v12  ;;  %v242_v22 = vmul.f32 %v865_v16, %v865_v16  ;;  %v880_v24 = vld [vmem:[%s816_s21 + $0x30] sm:$0xff]  ;;  %v243_v26 = vmul.f32 %v874_v20, %v874_v20  ;;  %v886_v28 = vld [vmem:[%s816_s21 + $0x38] sm:$0xff]  ;;  %s206_s21 = scalar_lea.vmem [#allocation5], %s475_s18 }
  0x40   : > { %309 = vperm.xlu1 %552, %v279_v3   ;;  %299 = vperm.xlu0 %551, %v277_v4   ;;  %v218_v21 = vadd.f32 %v217_v13, %v865_v16  ;;  %v246_v23 = vadd.f32 %v240_v15, %v238_v14  ;;  %v244_v30 = vmul.f32 %v880_v24, %v880_v24  ;;  %s380_s9 = sshll.u32 %s206_s21, 4  ;;  %s905_s9 = int_to_ptr.vmem [resolvable:$true] %s380_s9 }
  0x41   : > { %v227_v25 = vadd.f32 %v226_v17, %v874_v20  ;;  %v255_v27 = vadd.f32 %v241_v19, %v239_v18  ;;  %v245_v33 = vmul.f32 %v886_v28, %v886_v28  ;;  %s587_s24 = scalar_lea.vmem %s905_s9, 1024  ;;  %p594_p6 = scmp.lt.s32.totalorder %s905_s9, %s592_s29 }
  0x42   : > { %v219_v29 = vadd.f32 %v218_v21, %v880_v24  ;;  %v247_v31 = vadd.f32 %v246_v23, %v242_v22  ;;  %p588_p8 = scmp.ne.s32.totalorder %s905_s9, %s587_s24  ;;  %p595_p13 = scmp.lt.s32.totalorder %s593_s30, %s587_s24 }
  0x43   : > { %v228_v32 = vadd.f32 %v227_v25, %v886_v28  ;;  %v256_v34 = vadd.f32 %v255_v27, %v243_v26 }
  0x44   : > { %335 = vperm.xlu1 %552, %v281_v5   ;;  %330 = vperm.xlu0 %551, %v280_v6   ;;  %v220_v35 = vrot.slane %v219_v29, 4  ;;  %v248_v36 = vadd.f32 %v247_v31, %v244_v30  ;;  %p589_p11 = pnand %p588_p8, %p970_p9  ;;  %p596_p2 = por %p595_p13, %p594_p6 }
  0x45   : > { %v229_v37 = vrot.slane %v228_v32, 4  ;;  %v257_v38 = vadd.f32 %v256_v34, %v245_v33 }
  0x46   : > { %v221_v39 = vadd.f32 %v220_v35, %v219_v29  ;;  %v249_v40 = vrot.slane %v248_v36, 4  ;;  %p590_p0 = pneg %p589_p11 }
  0x47   : > { %v230_v41 = vadd.f32 %v229_v37, %v228_v32  ;;  %v258_v42 = vrot.slane %v257_v38, 4 }
  0x48   : > { %345 = vperm.xlu1 %552, %v283_v7   ;;  %340 = vperm.xlu0 %551, %v282_v8   ;;  %v222_v43 = vrot.slane %v221_v39, 2  ;;  %v250_v44 = vadd.f32 %v249_v40, %v248_v36  ;;  %p597_p5 = pnand %p596_p2, %p590_p0 }
  0x49   : > { %v231_v45 = vrot.slane %v230_v41, 2  ;;  %v259_v46 = vadd.f32 %v258_v42, %v257_v38 }
  0x4a   : > { %v223_v47 = vadd.f32 %v222_v43, %v221_v39  ;;  %v251_v48 = vrot.slane %v250_v44, 2 }
  0x4b   : > { %v232_v49 = vadd.f32 %v231_v45, %v230_v41  ;;  %v260_v50 = vrot.slane %v259_v46, 2 }
  0x4c   : > { %v224_v51 = vrot.slane %v223_v47, 1  ;;  %v252_v52 = vadd.f32 %v251_v48, %v250_v44 }
  0x4d   : > { %v233_v53 = vrot.slane %v232_v49, 1  ;;  %v261_v54 = vadd.f32 %v260_v50, %v259_v46 }
  0x4e   : > { %v225_v55 = vadd.f32 %v224_v51, %v223_v47  ;;  %v253_v56 = vrot.slane %v252_v52, 1 }
  0x4f   : > { %v234_v57 = vadd.f32 %v233_v53, %v232_v49  ;;  %v262_v58 = vrot.slane %v261_v54, 1 }
  0x50   : > { %v236_v59 = vmul.f32 0.03125, %v225_v55  ;;  %v254_v60 = vadd.f32 %v253_v56, %v252_v52 }
  0x51   : > { %v237_v61 = vmul.f32 0.03125, %v234_v57  ;;  %v263_v62 = vadd.f32 %v262_v58, %v261_v54 }
  0x52   : > { %v264_v63 = vmul.f32 0.03125, %v254_v60  ;;  %v266_v0 = vmul.f32 %v236_v59, %v236_v59  ;;  %v284_v21 = vsub.f32 %v847_v9, %v236_v59  ;;  %v286_v23 = vsub.f32 %v850_v10, %v236_v59 }
  0x53   : > { %v265_v1 = vmul.f32 0.03125, %v263_v62  ;;  %v267_v2 = vmul.f32 %v237_v61, %v237_v61  ;;  %v285_v22 = vsub.f32 %v853_v11, %v237_v61  ;;  %v287_v25 = vsub.f32 %v856_v12, %v237_v61 }
  0x54   : > { %v268_v3 = vsub.f32 %v264_v63, %v266_v0  ;;  %v290_v29 = vsub.f32 %v880_v24, %v236_v59  ;;  %v291_v30 = vsub.f32 %v886_v28, %v237_v61  ;;  %v288_v33 = vsub.f32 %v865_v16, %v236_v59 }
  0x55   : > { %v269_v4 = vsub.f32 %v265_v1, %v267_v2  ;;  %v289_v34 = vsub.f32 %v874_v20, %v237_v61 }
  0x56   : > { %v270_v5 = vmax.f32 %v268_v3, 0.0 }
  0x57   : > { %v271_v6 = vmax.f32 %v269_v4, 0.0 }
  0x58   : > { %v272_v7 = vadd.f32 1e-06, %v270_v5 }
  0x59   : > { %v273_v8 = vadd.f32 1e-06, %v271_v6 }
  0x5a   : > { %553 = vrsqrt.f32 %v272_v7 }
  0x5b   : > { %555 = vrsqrt.f32 %v273_v8 }
  0x64   : > { %v554_v13 = vpop.eup %553 }
  0x65   : > { %v556_v14 = vpop.eup %555 }
  0xbb   : > { %v305_v15 = vpop.permute.xlu1 %304  ;;  %v295_v17 = vpop.permute.xlu0 %294 }
  0xbc   : > { %v312_v18 = vmul.f32 %v554_v13, %v295_v17  ;;  %v313_v19 = vmul.f32 %v556_v14, %v295_v17  ;;  %v316_v9 = vmul.f32 %v554_v13, %v305_v15  ;;  %v317_v11 = vmul.f32 %v556_v14, %v305_v15 }
  0xbe   : > { %v320_v35 = vmul.f32 %v312_v18, %v284_v21  ;;  %v321_v10 = vmul.f32 %v313_v19, %v285_v22  ;;  %v324_v43 = vmul.f32 %v316_v9, %v288_v33  ;;  %v325_v44 = vmul.f32 %v317_v11, %v289_v34 }
  0xbf   : > { %v310_v26 = vpop.permute.xlu1 %309  ;;  %v300_v27 = vpop.permute.xlu0 %299 }
  0xc0   : > { %v314_v31 = vmul.f32 %v554_v13, %v300_v27  ;;  %v315_v32 = vmul.f32 %v556_v14, %v300_v27  ;;  %v318_v36 = vmul.f32 %v554_v13, %v310_v26  ;;  %v319_v12 = vmul.f32 %v556_v14, %v310_v26 }
  0xc2   : > { %v322_v37 = vmul.f32 %v314_v31, %v286_v23  ;;  %v323_v38 = vmul.f32 %v315_v32, %v287_v25  ;;  %v326_v20 = vmul.f32 %v318_v36, %v290_v29  ;;  %v327_v42 = vmul.f32 %v319_v12, %v291_v30 }
  0xc3   : > { %v336_v24 = vpop.permute.xlu1 %335  ;;  %v331_v28 = vpop.permute.xlu0 %330 }
  0xc4   : > { %v350_v39 = vadd.f32 %v336_v24, %v322_v37  ;;  %v351_v40 = vadd.f32 %v336_v24, %v323_v38  ;;  %v348_v41 = vadd.f32 %v331_v28, %v320_v35  ;;  %v349_v16 = vadd.f32 %v331_v28, %v321_v10 }
  0xc6   : > { %358 = vst [vmem:[%s206_s21 + $0x10] sm:$0xff] %v350_v39  ;;  %359 = vst [vmem:[%s206_s21 + $0x18] sm:$0xff] %v351_v40 }
  0xc7   : > { %356 = vst [vmem:[%s206_s21] sm:$0xff] %v348_v41  ;;  %357 = vst [vmem:[%s206_s21 + $0x8] sm:$0xff] %v349_v16  ;;  %v346_v45 = vpop.permute.xlu1 %345  ;;  %v341_v46 = vpop.permute.xlu0 %340 }
  0xc8   : > { %v354_v47 = vadd.f32 %v346_v45, %v326_v20  ;;  %v355_v48 = vadd.f32 %v346_v45, %v327_v42  ;;  %v352_v49 = vadd.f32 %v341_v46, %v324_v43  ;;  %v353_v50 = vadd.f32 %v341_v46, %v325_v44 }
  0xca   : > { %362 = vst [vmem:[%s206_s21 + $0x30] sm:$0xff] %v354_v47  ;;  %363 = vst [vmem:[%s206_s21 + $0x38] sm:$0xff] %v355_v48 }
  0xcb   : > { %360 = vst [vmem:[%s206_s21 + $0x20] sm:$0xff] %v352_v49  ;;  %361 = vst [vmem:[%s206_s21 + $0x28] sm:$0xff] %v353_v50 }
  0xcc   : > { %600 = shalt.err (!%p597_p5)
}
  0xcd   : > { %s601_s4 = scalar_lea.hbm %s910_s15, 1024  ;;  %s605_s19 = scalar_lea.hbm %s962_s3, 2048 }
  0xce   : > { %p602_p4 = scmp.ne.s32.totalorder %s910_s15, %s601_s4  ;;  %p606_p12 = scmp.lt.u32.totalorder %s910_s15, %s962_s3 }
  0xcf   : > { %p607_p1 = scmp.lt.u32.totalorder %s605_s19, %s601_s4  ;;  %p609_p8 = scmp.lt.u32.totalorder %s601_s4, %s910_s15 }
  0xd0   : > { %p603_p7 = pnand %p602_p4, %p970_p9 }
  0xd1   : > { %p608_p3 = por %p607_p1, %p606_p12 }
  0xd2   : > { %p604_p10 = pneg %p603_p7 }
  0xd3   : > { %p610_p11 = por %p609_p8, %p608_p3 }
  0xd5   : > { %p611_p0 = pnand %p610_p11, %p604_p10 }
  0xd7   : > { %614 = shalt.err (!%p611_p0)
}
  0xd8   : > { %s676_s21 = smov 256   ;;  %s677_s10 = smov 16  }
  0xd9   : > { %486 = dma.vmem_to_hbm [thread:$0]  (%p970_p9), %s905_s9, 1024, %s910_s15, %s365_s23, %s676_s21, %s676_s21, %s677_s10  }
  0xda PF: > { %s395_s18 = sand.u32 1, %s649_s12   ;;  %p971_p6 = scmp.ne.s32.totalorder %s967_s27, 0 }
  0xdb   : > { %p972_p13 = scmp.ge.s32.totalorder %s669_s17, 2  ;;  %s396_s22 = scalar_lea.sflag [#allocation4], %s395_s18 }
  0xdd   : > { %p493_p2 = pnand %p972_p13, %p971_p6 }
  0xdf   : > { %644 = dma.done.wait (!%p493_p2), %s396_s22, 1024  }
  0xe0   : > { %646 = vsyncadd (!%p493_p2), %s396_s22, 4294966272  ;;  %s19_s17 = sadd.s32 1, %s669_s17   ;;  %s973_s12 = smov %s653_s13 }
  0xe1   : > { %p16_p5 = scmp.ge.s32.totalorder %s19_s17, 4   ;;  %s974_s13 = smov %s657_s14 }
  0xe2   : > { %s975_s14 = smov %s754_s26  ;;  %s976_s15 = smov %s665_s16 }
  0xe3   : > { %s977_s16 = smov %s979_s20  ;;  %18 = sbr.rel (!%p16_p5) target bundleno = 6 (0x6), region = 77 }
  0xea   :  { %401 = vsyncpa [#allocation3], 1 }
  0xeb   :  { %403 = vsyncpa [#allocation3 + $0x1], 1 }
  0xec   :  { %404 = vsyncpa [#allocation4], 1 }
  0xed   :  { %406 = vsyncpa [#allocation4 + $0x1], 1 }

</bundles_post_ra>
